<compile_context>
chip_gen: v7x
topology: tpu7x:2x2x1
jax: 0.10.0
libtpu: 0.0.40
codegen_flags: <defaults>
</compile_context>

<pallas_src>
import functools

import numpy as np
import jax
import jax.numpy as jnp
from jax import lax
from jax.experimental import pallas as pl
from jax.experimental.pallas import tpu as pltpu


def _batch_tile(B, target=256):
    """MXU-friendly batch tile: 256 rows fills the v6e/v7x MXU (and is a
    multiple of 128 for v5e).  Fall back to the whole batch as one block
    (legal: block_shape equal to the full array dims)."""
    for tb in (target, 128, 64, 32, 16, 8):
        if tb <= B and B % tb == 0:
            return tb
    return B


# -----------------------------------------------------------------------------
# 1) Single-state forward (module-faithful): dydt = A @ state + b.
#    One tiny matvec -> VPU broadcast-mul + sublane reduce (no MXU fill/drain),
#    grid-less, all operands resident in VMEM.  At D=32 the launch/DMA cost
#    dominates -- prefer the batched kernel below for real workloads.
# -----------------------------------------------------------------------------
def _fwd_single_kernel(a_t_ref, s_col_ref, b_row_ref, o_ref):
    # dydt[j] = sum_i A[j, i] * s[i] = sum_i A^T[i, j] * s[i]
    prod = a_t_ref[...] * s_col_ref[...]                  # VPU broadcast-mul
    o_ref[...] = jnp.sum(prod, axis=0, keepdims=True) + b_row_ref[...]


def linear_ode_forward(A, b, time, state):
    """Pallas equivalent of LinearODE.forward(time, state) for one state."""
    del time  # unused in the forward pass, same as the PyTorch module
    D = A.shape[0]
    vmem = pl.BlockSpec(memory_space=pltpu.MemorySpace.VMEM)
    out = pl.pallas_call(
        _fwd_single_kernel,
        out_shape=jax.ShapeDtypeStruct((1, D), jnp.float32),
        in_specs=[vmem, vmem, vmem],
        out_specs=vmem,
    )(A.T, state.reshape(D, 1), b.reshape(1, D))
    return out.reshape(D)


# -----------------------------------------------------------------------------
# 2) Batched forward (performance path): dydt[n] = A @ states[n] + b.
#    states laid out as rows -> out = states @ A^T + b (lane-dense output),
#    MXU matmul at f32 accuracy, A^T/b resident via constant index_map,
#    batch grid axis marked "parallel" (uses both TCs on v7x).
# -----------------------------------------------------------------------------
def _fwd_batched_kernel(a_t_ref, b_row_ref, s_ref, o_ref):
    o_ref[...] = (
        jnp.dot(
            s_ref[...],
            a_t_ref[...],
            preferred_element_type=jnp.float32,
            precision=lax.Precision.HIGHEST,   # true-f32 accuracy on the MXU
        )
        + b_row_ref[...]
    )


def linear_ode_forward_batched(A, b, time, states):
    del time
    B, D = states.shape
    TB = _batch_tile(B)
    return pl.pallas_call(
        _fwd_batched_kernel,
        out_shape=jax.ShapeDtypeStruct((B, D), jnp.float32),
        grid=(B // TB,),
        in_specs=[
            pl.BlockSpec((D, D), lambda i: (0, 0)),    # A^T: resident, no re-DMA
            pl.BlockSpec((1, D), lambda i: (0, 0)),    # b row: resident
            pl.BlockSpec((TB, D), lambda i: (i, 0)),   # state tile
        ],
        out_specs=pl.BlockSpec((TB, D), lambda i: (i, 0)),
        compiler_params=pltpu.CompilerParams(dimension_semantics=("parallel",)),
    )(A.T, b.reshape(1, D), states)


# -----------------------------------------------------------------------------
# 3) Fused, batched explicit-Euler integrator.  dt folded host-side:
#       s_{k+1} = s_k @ (I + dt*A)^T + dt*b
#    Operands hoisted out of the (fully unrolled) step loop; one pallas_call
#    per batch tile amortizes launch cost over all steps and all states.
# -----------------------------------------------------------------------------
def _euler_batched_kernel(m_t_ref, c_row_ref, s_ref, o_ref, *, num_steps):
    # Hoist resident operands: they live in vregs across every step
    # (~5-9 vregs total -> no spill risk).
    m_t = m_t_ref[...]
    c = c_row_ref[...]

    def step(_, s):
        return (
            jnp.dot(s, m_t, preferred_element_type=jnp.float32,
                    precision=lax.Precision.HIGHEST)
            + c
        )

    # num_steps is static & small: fully unroll so the scheduler sees across
    # iterations and no per-step compare/branch sits on the serial chain.
    o_ref[...] = lax.fori_loop(0, num_steps, step, s_ref[...], unroll=True)


def linear_ode_integrate(A, b, states0, *, dt, num_steps):
    """num_steps explicit-Euler steps of dy/dt = A y + b (each step's dydt is
    exactly the module forward), fused into one Pallas kernel per batch tile.
    states0: (D,) or (B, D)."""
    single = states0.ndim == 1
    s0 = states0.reshape(1, -1) if single else states0
    B, D = s0.shape

    # Host-side fold (free): shortens the per-step dependence chain.
    m_t = jnp.eye(D, dtype=jnp.float32) + jnp.float32(dt) * A.T
    c_row = (jnp.float32(dt) * b).reshape(1, D)

    TB = _batch_tile(B)
    kernel = functools.partial(_euler_batched_kernel, num_steps=int(num_steps))
    out = pl.pallas_call(
        kernel,
        out_shape=jax.ShapeDtypeStruct((B, D), jnp.float32),
        grid=(B // TB,),
        in_specs=[
            pl.BlockSpec((D, D), lambda i: (0, 0)),    # M^T: resident
            pl.BlockSpec((1, D), lambda i: (0, 0)),    # c:   resident
            pl.BlockSpec((TB, D), lambda i: (i, 0)),   # initial-state tile
        ],
        out_specs=pl.BlockSpec((TB, D), lambda i: (i, 0)),
        compiler_params=pltpu.CompilerParams(dimension_semantics=("parallel",)),
    )(m_t, c_row, s0)
    return out.reshape(D) if single else out


if __name__ == "__main__":
    D = 32    # system dimension (A: DxD, b: D, state: D)
    B = 512   # batch of independent states = 2 x 256-row MXU tiles

    key = jax.random.PRNGKey(0)
    k_a, k_b, k_s, k_bs = jax.random.split(key, 4)
    A = jax.random.normal(k_a, (D, D), dtype=jnp.float32) * 0.1
    b = jax.random.normal(k_b, (D,), dtype=jnp.float32)
    state = jax.random.normal(k_s, (D,), dtype=jnp.float32)
    states = jax.random.normal(k_bs, (B, D), dtype=jnp.float32)
    time = jnp.float32(0.0)

    # float64 references on host
    A64 = np.asarray(A, np.float64)
    b64 = np.asarray(b, np.float64)
    s64 = np.asarray(state, np.float64)
    S64 = np.asarray(states, np.float64)

    # --- module-faithful single forward: dydt = A @ state + b ---
    dydt = jax.block_until_ready(linear_ode_forward(A, b, time, state))
    assert dydt.shape == (D,)
    assert np.allclose(np.asarray(dydt, np.float64), A64 @ s64 + b64,
                       atol=1e-5, rtol=1e-5)

    # --- batched forward (the performance path) ---
    dydt_b = jax.block_until_ready(linear_ode_forward_batched(A, b, time, states))
    ref_b = S64 @ A64.T + b64[None, :]
    assert dydt_b.shape == (B, D)
    assert np.allclose(np.asarray(dydt_b, np.float64), ref_b,
                       atol=1e-4, rtol=1e-4)

    # --- fused, batched explicit-Euler integration ---
    dt, num_steps = 0.05, 16
    y = jax.block_until_ready(
        linear_ode_integrate(A, b, states, dt=dt, num_steps=num_steps))
    y_ref = S64.copy()
    for _ in range(num_steps):
        y_ref = y_ref + dt * (y_ref @ A64.T + b64[None, :])
    assert y.shape == (B, D)
    assert np.allclose(np.asarray(y, np.float64), y_ref, atol=1e-3, rtol=1e-3)

    print("KERNEL_OK")
</pallas_src>

<mosaic_0001>
module attributes {stable_mosaic.version = 11 : i64} {
  func.func @_fwd_single_kernel(%arg0: memref<32x32xf32, #tpu.memory_space<vmem>>, %arg1: memref<32x1xf32, #tpu.memory_space<vmem>>, %arg2: memref<1x32xf32, #tpu.memory_space<vmem>>, %arg3: memref<1x32xf32, #tpu.memory_space<vmem>>) attributes {dimension_semantics = [], scalar_prefetch = 0 : i64, scratch_operands = 0 : i64, tpu.core_type = #tpu.core_type<tc>} {
    %c0 = arith.constant 0 : index
    %c0_0 = arith.constant 0 : index
    %0 = vector.load %arg0[%c0, %c0_0] : memref<32x32xf32, #tpu.memory_space<vmem>>, vector<32x32xf32>
    %c0_1 = arith.constant 0 : index
    %c0_2 = arith.constant 0 : index
    %1 = vector.load %arg1[%c0_1, %c0_2] : memref<32x1xf32, #tpu.memory_space<vmem>>, vector<32x1xf32>
    %2 = vector.broadcast %1 : vector<32x1xf32> to vector<32x32xf32>
    %3 = arith.mulf %0, %2 : vector<32x32xf32>
    %cst = arith.constant dense<0.000000e+00> : vector<32xf32>
    %4 = vector.multi_reduction <add>, %3, %cst [0] : vector<32x32xf32> to vector<32xf32>
    %5 = vector.shape_cast %4 : vector<32xf32> to vector<1x32xf32>
    %c0_3 = arith.constant 0 : index
    %c0_4 = arith.constant 0 : index
    %6 = vector.load %arg2[%c0_3, %c0_4] : memref<1x32xf32, #tpu.memory_space<vmem>>, vector<1x32xf32>
    %7 = arith.addf %5, %6 : vector<1x32xf32>
    %c0_5 = arith.constant 0 : index
    %c0_6 = arith.constant 0 : index
    %8 = vector.load %arg3[%c0_5, %c0_6] : memref<1x32xf32, #tpu.memory_space<vmem>>, vector<1x32xf32>
    tpu.vector_store %arg3[%c0_5, %c0_6], %7 {strides = array<i32>} : memref<1x32xf32, #tpu.memory_space<vmem>>, vector<1x32xf32>,
    return
  }
}

</mosaic_0001>

<bundles_post_ra>
// kernel: tpu_custom_call.1
= control target key start
LH: loop header
LB: loop body
LE: loop exit
PB: predicated region body
PF: predicated region fallthrough
CT: control target
= control target key end

     0   :  { %v107_v2 = vmov 0   ;;  %s168_s0 = inlined_call_operand.vmem [shape: f32[32,32], index: 0, kind: input, shape index: {}]   ;;  %s169_s1 = inlined_call_operand.vmem [shape: f32[32,1], index: 1, kind: input, shape index: {}]   ;;  %s170_s2 = inlined_call_operand.vmem [shape: f32[1,32], index: 2, kind: input, shape index: {}]   ;;  %s171_s3 = inlined_call_operand.hbm [shape: f32[1,32], index: 3, kind: output, shape index: {}]  }
   0x1   :  { %v21_v0 = vld [vmem:[%s169_s1 + $0x10] sm:$0xff]  ;;  %v19_v1 = vld [vmem:[%s169_s1] sm:$0xff]  ;;  %82 = vset.pattern.permute.xlu1 %v107_v2  ;;  %81 = vset.pattern.permute.xlu0 %v107_v2 }
   0x2   :  { %35 = vperm.xlu1 %82, %v21_v0   ;;  %25 = vperm.xlu0 %81, %v19_v1  }
   0x3   :  { %8 = vsyncpa [#allocation3], 0  ;;  %v22_v3 = vld [vmem:[%s169_s1 + $0x18] sm:$0xff]  ;;  %v20_v4 = vld [vmem:[%s169_s1 + $0x8] sm:$0xff]  ;;  %vm47_vm0 = vcmask 261120   ;;  %vm63_vm1 = vcmask 253952  }
   0x4   :  { %v15_v7 = vld [vmem:[%s168_s0] sm:$0xff]  ;;  %v17_v8 = vld [vmem:[%s168_s0 + $0x10] sm:$0xff]  ;;  %v16_v9 = vld [vmem:[%s168_s0 + $0x8] sm:$0xff] }
   0x5   :  { %v18_v12 = vld [vmem:[%s168_s0 + $0x18] sm:$0xff]  ;;  %v61_v29 = vld [vmem:[%s170_s2] sm:$0x1]  ;;  %s108_s0 = smov [#allocation2]  }
   0x6   :  { %40 = vperm.xlu1 %82, %v22_v3   ;;  %30 = vperm.xlu0 %81, %v20_v4   ;;  %s71_s29 = sshll.u32 %s108_s0, 4  ;;  %s72_s29 = int_to_ptr.vmem [resolvable:$true] %s71_s29 }
   0x7   :  { %s83_s30 = scalar_lea.vmem %s72_s29, 16  ;;  %s87_s4 = scalar_lea.vmem %s72_s29, 32 }
   0x8   :  { %p84_p0 = scmp.ne.s32.totalorder %s72_s29, %s83_s30  ;;  %p88_p1 = scmp.lt.s32.totalorder %s72_s29, %s72_s29 }
   0x9   :  { %p89_p2 = scmp.lt.s32.totalorder %s87_s4, %s83_s30 }
   0xb   :  { %p90_p3 = por %p89_p2, %p88_p1 }
   0xd   :  { %p91_p4 = pnand %p90_p3, %p84_p0 }
  0x81   :  { %v36_v5 = vpop.permute.xlu1 %35  ;;  %v26_v6 = vpop.permute.xlu0 %25 }
  0x82   :  { %v43_v10 = vmul.f32 %v26_v6, %v15_v7  ;;  %v45_v14 = vmul.f32 %v36_v5, %v17_v8 }
  0x84   :  { %v48_v16 = vsel %vm47_vm0, %v43_v10, 0.0  ;;  %v51_v20 = vsel %vm47_vm0, %v45_v14, 0.0 }
  0x85   :  { %v41_v11 = vpop.permute.xlu1 %40  ;;  %v31_v13 = vpop.permute.xlu0 %30 }
  0x86   :  { %v44_v15 = vmul.f32 %v31_v13, %v16_v9  ;;  %v46_v17 = vmul.f32 %v41_v11, %v18_v12 }
  0x88   :  { %v49_v18 = vsel %vm47_vm0, %v44_v15, 0.0  ;;  %v53_v22 = vsel %vm47_vm0, %v46_v17, 0.0 }
  0x89   :  { %v50_v19 = vadd.f32 %v49_v18, %v48_v16 }
  0x8b   :  { %v52_v21 = vadd.f32 %v51_v20, %v50_v19 }
  0x8d   :  { %v54_v23 = vadd.f32 %v53_v22, %v52_v21 }
  0x8f   :  { %v55_v24 = vrot.slane %v54_v23, 4 }
  0x91   :  { %v56_v25 = vadd.f32 %v55_v24, %v54_v23 }
  0x93   :  { %v57_v26 = vrot.slane %v56_v25, 2 }
  0x95   :  { %v58_v27 = vadd.f32 %v57_v26, %v56_v25 }
  0x97   :  { %v59_v28 = vrot.slane %v58_v27, 1 }
  0x99   :  { %v60_v30 = vadd.f32 %v59_v28, %v58_v27 }
  0x9b   :  { %v62_v31 = vadd.f32 %v61_v29, %v60_v30 }
  0x9d   :  { %64 = vst.msk [vmem:[#allocation2] sm:$0x1] %vm63_vm1, %v62_v31 }
  0x9e   :  { %94 = shalt.err (!%p91_p4)
}
  0x9f   :  { %s95_s7 = scalar_lea.hbm %s171_s3, 16 }
  0xa0   :  { %p96_p5 = scmp.ne.s32.totalorder %s171_s3, %s95_s7  ;;  %p99_p6 = scmp.lt.u32.totalorder %s95_s7, %s171_s3 }
  0xa2   :  { %p101_p7 = pnand %p99_p6, %p96_p5 }
  0xa4   :  { %104 = shalt.err (!%p101_p7)
}
  0xa5   :  { %74 = dma.vmem_to_hbm [thread:$0]  %s72_s29, 16, %s171_s3, [#allocation3]  }
  0xa6   :  { %105 = dma.done.wait [#allocation3], 16  }
  0xa7   :  { %106 = vsyncadd [#allocation3], 4294967280 }
  0xa8   :  { %78 = vsyncpa [#allocation3], 1 }

</bundles_post_ra>
